<compile_context>
chip_gen: v6e
topology: v6e:2x2x1
jax: 0.10.0
libtpu: 0.0.40
codegen_flags: <defaults>
</compile_context>

<pallas_src>
import functools

import jax
import jax.numpy as jnp
from jax import lax
from jax.experimental import pallas as pl
from jax.experimental.pallas import tpu as pltpu

_SMOOTH = 1e-5
_LANE = 128
_SUB = 8


def _dice_kernel(p_ref, t_ref, out_ref,
                 num0_ref, den0_ref, num1_ref, den1_ref,
                 *, s_valid, ts_r, need_mask):
    # p_ref: (bt, C, ts_r, 128) logits (all channels)
    # t_ref: (bt, 2, ts_r, 128) target channels 0..1 only
    # out_ref: (bt, 1) per-batch combined dice loss (written on last S step)
    s_idx = pl.program_id(1)
    ns = pl.num_programs(1)

    @pl.when(s_idx == 0)
    def _():
        num0_ref[...] = jnp.zeros_like(num0_ref)
        den0_ref[...] = jnp.zeros_like(den0_ref)
        num1_ref[...] = jnp.zeros_like(num1_ref)
        den1_ref[...] = jnp.zeros_like(den1_ref)

    p = p_ref[...].astype(jnp.float32)

    # Numerically stable softmax over the channel axis (axis=1, non-minor ->
    # cheap elementwise work across vregs).
    m = jnp.max(p, axis=1, keepdims=True)                    # (bt,1,ts_r,128)
    e = jnp.exp(p - m)                                       # (bt,C,ts_r,128)
    inv = 1.0 / jnp.sum(e, axis=1, keepdims=True)            # (bt,1,ts_r,128)
    pred0 = e[:, 0:1] * inv                                  # (bt,1,ts_r,128)
    pred1 = e[:, 1:2] * inv

    tile_px = ts_r * _LANE
    if need_mask:
        # Zero out softmax values in the spatial padding region.
        row = lax.broadcasted_iota(jnp.int32, (ts_r, _LANE), 0)
        col = lax.broadcasted_iota(jnp.int32, (ts_r, _LANE), 1)
        idx = (s_idx * ts_r + row) * _LANE + col
        mask = (idx < s_valid).astype(jnp.float32)
        pred0 = pred0 * mask
        pred1 = pred1 * mask
        n_valid = jnp.minimum(
            jnp.maximum(s_valid - s_idx * tile_px, 0), tile_px
        ).astype(jnp.float32)
    else:
        n_valid = jnp.float32(tile_px)

    t0 = t_ref[:, 0:1].astype(jnp.float32)                   # (bt,1,ts_r,128)
    t1 = t_ref[:, 1:2].astype(jnp.float32)

    sum_p0 = jnp.sum(pred0, axis=(2, 3))                     # (bt,1)
    sum_p1 = jnp.sum(pred1, axis=(2, 3))
    sum_p0t0 = jnp.sum(pred0 * t0, axis=(2, 3))              # pad t0 == 0
    sum_p1t1 = jnp.sum(pred1 * t1, axis=(2, 3))
    sum_t0 = jnp.sum(t0, axis=(2, 3))
    sum_t1 = jnp.sum(t1, axis=(2, 3))

    # Channel-0 target is (1 - t0): handled algebraically, never materialized.
    num0_ref[...] += sum_p0 - sum_p0t0
    den0_ref[...] += sum_p0 + (n_valid - sum_t0)
    num1_ref[...] += sum_p1t1
    den1_ref[...] += sum_p1 + sum_t1

    @pl.when(s_idx == ns - 1)
    def _():
        d0 = (num0_ref[...] + _SMOOTH) / (den0_ref[...] + _SMOOTH)
        d1 = (num1_ref[...] + _SMOOTH) / (den1_ref[...] + _SMOOTH)
        # ((1 - 2*d0) + (1 - 2*d1)) / 2 == 1 - d0 - d1
        out_ref[...] = 1.0 - d0 - d1


@jax.jit
def dice_loss_pallas(predicts, target):
    """Dice_Loss forward.  predicts/target: (B, C, H, W), C >= 2."""
    B, C, H, W = predicts.shape
    assert target.shape == predicts.shape
    assert C >= 2
    S = H * W

    # Batch tile: prefer >1 to amortize per-step overhead, but keep the
    # parallel grid axis >= 2 whenever possible (dual-TC occupancy on v7x).
    bt = 1
    for cand in (8, 4, 2):
        if B % cand == 0 and B // cand >= 2:
            bt = cand
            break
    bg = B // bt

    # Spatial tiling: minor two dims are (ts_r rows x 128 lanes).  Budget
    # ~<=2 MiB of f32 predicts per block so the double-buffered footprint of
    # both inputs fits every generation's scoped-VMEM default (incl. v5e's
    # 16 MiB) with headroom — no vmem_limit_bytes needed.
    Sr = pl.cdiv(S, _LANE)
    row_bytes = bt * C * _LANE * 4
    blk_rows = (2 * 1024 * 1024) // row_bytes
    if Sr <= max(blk_rows, _SUB):
        ts_r = Sr                       # one spatial step, full (exempt) dim
    else:
        ts_r = max(_SUB, (min(512, blk_rows) // _SUB) * _SUB)
    Sr_pad = pl.cdiv(Sr, ts_r) * ts_r
    ns = Sr_pad // ts_r
    S_pad = Sr_pad * _LANE
    need_mask = S_pad != S

    p = predicts.reshape(B, C, S)
    t = target.reshape(B, C, S)
    if need_mask:
        p = jnp.pad(p, ((0, 0), (0, 0), (0, S_pad - S)))
        t = jnp.pad(t, ((0, 0), (0, 0), (0, S_pad - S)))
    p = p.reshape(bg, bt, C, Sr_pad, _LANE)
    t = t.reshape(bg, bt, C, Sr_pad, _LANE)

    kernel = functools.partial(
        _dice_kernel, s_valid=S, ts_r=ts_r, need_mask=need_mask)

    per_batch = pl.pallas_call(
        kernel,
        out_shape=jax.ShapeDtypeStruct((bg, bt, 1), jnp.float32),
        grid_spec=pltpu.PrefetchScalarGridSpec(
            num_scalar_prefetch=0,
            grid=(bg, ns),
            in_specs=[
                # predicts: all channels (softmax needs them)
                pl.BlockSpec((None, bt, C, ts_r, _LANE),
                             lambda g, s: (g, 0, 0, s, 0)),
                # target: DMA only channels 0..1 (channel-block index 0)
                pl.BlockSpec((None, bt, 2, ts_r, _LANE),
                             lambda g, s: (g, 0, 0, s, 0)),
            ],
            out_specs=pl.BlockSpec((None, bt, 1), lambda g, s: (g, 0, 0)),
            scratch_shapes=[pltpu.VMEM((bt, 1), jnp.float32)] * 4,
        ),
        compiler_params=pltpu.CompilerParams(
            dimension_semantics=("parallel", "arbitrary")),
    )(p, t)

    # mean_b((d0_b + d1_b)/2) == (mean_b d0 + mean_b d1)/2  (mean is linear)
    return jnp.mean(per_batch)


def _dice_ref(predicts, target):
    """Pure-JAX reference mirroring the PyTorch Dice_Loss module."""
    preds = jax.nn.softmax(predicts.astype(jnp.float32), axis=1)
    tgt = target.astype(jnp.float32)

    def dl(pred, t):
        b = pred.shape[0]
        pf = pred.reshape(b, -1)
        tf = t.reshape(b, -1)
        inter = jnp.sum(pf * tf, axis=1) + _SMOOTH
        union = jnp.sum(pf, axis=1) + jnp.sum(tf, axis=1) + _SMOOTH
        return jnp.mean(1.0 - 2.0 * inter / union)

    l0 = dl(preds[:, 0], 1.0 - tgt[:, 0])
    l1 = dl(preds[:, 1], tgt[:, 1])
    return (l0 + l1) / 2.0


if __name__ == "__main__":
    B, C, H, W = 2, 4, 16, 16
    key = jax.random.PRNGKey(0)
    kp, kt = jax.random.split(key)
    predicts = jax.random.normal(kp, (B, C, H, W), dtype=jnp.float32)
    # Target is an exact 0/1 mask -> carry it in bf16 (lossless) so the
    # bandwidth-bound kernel streams half the target bytes; compute stays f32.
    target = (jax.random.uniform(kt, (B, C, H, W)) > 0.5).astype(jnp.bfloat16)

    loss = dice_loss_pallas(predicts, target)
    jax.block_until_ready(loss)

    ref = _dice_ref(predicts, target)
    assert jnp.allclose(loss, ref, rtol=1e-5, atol=1e-5), (loss, ref)
    print("KERNEL_OK")
</pallas_src>

<mosaic_0001>
module attributes {stable_mosaic.version = 11 : i64} {
  func.func @_dice_kernel(%arg0: i32, %arg1: i32, %arg2: memref<1x1x4x2x128xf32, #tpu.memory_space<vmem>>, %arg3: memref<1x1x2x2x128xbf16, #tpu.memory_space<vmem>>, %arg4: memref<1x1x1xf32, #tpu.memory_space<vmem>>, %arg5: memref<1x1xf32, #tpu.memory_space<vmem>>, %arg6: memref<1x1xf32, #tpu.memory_space<vmem>>, %arg7: memref<1x1xf32, #tpu.memory_space<vmem>>, %arg8: memref<1x1xf32, #tpu.memory_space<vmem>>) attributes {dimension_semantics = [#tpu.dimension_semantics<parallel>, #tpu.dimension_semantics<arbitrary>], iteration_bounds = array<i64: 2, 1>, scalar_prefetch = 0 : i64, scratch_operands = 4 : i64, tpu.core_type = #tpu.core_type<tc>, window_params = [{transform_indices = @transform_0, window_bounds = array<i64: 1, 1, 4, 2, 128>}, {transform_indices = @transform_1, window_bounds = array<i64: 1, 1, 2, 2, 128>}, {transform_indices = @transform_2, window_bounds = array<i64: 1, 1, 1>}]} {
    %c0_i32 = arith.constant 0 : i32
    %0 = arith.cmpi eq, %arg1, %c0_i32 : i32
    %1 = arith.extui %0 : i1 to i32
    %c0_i32_0 = arith.constant 0 : i32
    %2 = arith.cmpi ne, %1, %c0_i32_0 : i32
    scf.if %2 {
      %cst_41 = arith.constant 0.000000e+00 : f32
      %52 = vector.broadcast %cst_41 : f32 to vector<1x1xf32>
      %c0_42 = arith.constant 0 : index
      %c0_43 = arith.constant 0 : index
      %53 = vector.load %arg5[%c0_42, %c0_43] : memref<1x1xf32, #tpu.memory_space<vmem>>, vector<1x1xf32>
      tpu.vector_store %arg5[%c0_42, %c0_43], %52 {strides = array<i32>} : memref<1x1xf32, #tpu.memory_space<vmem>>, vector<1x1xf32>,
      %cst_44 = arith.constant 0.000000e+00 : f32
      %54 = vector.broadcast %cst_44 : f32 to vector<1x1xf32>
      %c0_45 = arith.constant 0 : index
      %c0_46 = arith.constant 0 : index
      %55 = vector.load %arg6[%c0_45, %c0_46] : memref<1x1xf32, #tpu.memory_space<vmem>>, vector<1x1xf32>
      tpu.vector_store %arg6[%c0_45, %c0_46], %54 {strides = array<i32>} : memref<1x1xf32, #tpu.memory_space<vmem>>, vector<1x1xf32>,
      %cst_47 = arith.constant 0.000000e+00 : f32
      %56 = vector.broadcast %cst_47 : f32 to vector<1x1xf32>
      %c0_48 = arith.constant 0 : index
      %c0_49 = arith.constant 0 : index
      %57 = vector.load %arg7[%c0_48, %c0_49] : memref<1x1xf32, #tpu.memory_space<vmem>>, vector<1x1xf32>
      tpu.vector_store %arg7[%c0_48, %c0_49], %56 {strides = array<i32>} : memref<1x1xf32, #tpu.memory_space<vmem>>, vector<1x1xf32>,
      %cst_50 = arith.constant 0.000000e+00 : f32
      %58 = vector.broadcast %cst_50 : f32 to vector<1x1xf32>
      %c0_51 = arith.constant 0 : index
      %c0_52 = arith.constant 0 : index
      %59 = vector.load %arg8[%c0_51, %c0_52] : memref<1x1xf32, #tpu.memory_space<vmem>>, vector<1x1xf32>
      tpu.vector_store %arg8[%c0_51, %c0_52], %58 {strides = array<i32>} : memref<1x1xf32, #tpu.memory_space<vmem>>, vector<1x1xf32>,
    } else {
    }
    %c0 = arith.constant 0 : index
    %c0_1 = arith.constant 0 : index
    %c0_2 = arith.constant 0 : index
    %c0_3 = arith.constant 0 : index
    %c0_4 = arith.constant 0 : index
    %3 = vector.load %arg2[%c0, %c0_1, %c0_2, %c0_3, %c0_4] : memref<1x1x4x2x128xf32, #tpu.memory_space<vmem>>, vector<1x1x4x2x128xf32>
    %4 = vector.shape_cast %3 : vector<1x1x4x2x128xf32> to vector<1x4x2x128xf32>
    %cst = arith.constant dense<0xFF800000> : vector<1x2x128xf32>
    %5 = vector.multi_reduction <maximumf>, %4, %cst [1] : vector<1x4x2x128xf32> to vector<1x2x128xf32>
    %6 = vector.shape_cast %5 : vector<1x2x128xf32> to vector<1x1x2x128xf32>
    %7 = vector.broadcast %6 : vector<1x1x2x128xf32> to vector<1x4x2x128xf32>
    %8 = arith.subf %4, %7 : vector<1x4x2x128xf32>
    %9 = math.exp %8 : vector<1x4x2x128xf32>
    %cst_5 = arith.constant dense<0.000000e+00> : vector<1x2x128xf32>
    %10 = vector.multi_reduction <add>, %9, %cst_5 [1] : vector<1x4x2x128xf32> to vector<1x2x128xf32>
    %11 = vector.shape_cast %10 : vector<1x2x128xf32> to vector<1x1x2x128xf32>
    %cst_6 = arith.constant 1.000000e+00 : f32
    %12 = vector.broadcast %cst_6 : f32 to vector<1x1x2x128xf32>
    %13 = arith.divf %12, %11 : vector<1x1x2x128xf32>
    %14 = vector.extract_strided_slice %9 {offsets = [0, 0, 0, 0], sizes = [1, 1, 2, 128], strides = [1, 1, 1, 1]} : vector<1x4x2x128xf32> to vector<1x1x2x128xf32>
    %15 = arith.mulf %14, %13 : vector<1x1x2x128xf32>
    %16 = vector.extract_strided_slice %9 {offsets = [0, 1, 0, 0], sizes = [1, 1, 2, 128], strides = [1, 1, 1, 1]} : vector<1x4x2x128xf32> to vector<1x1x2x128xf32>
    %17 = arith.mulf %16, %13 : vector<1x1x2x128xf32>
    %c0_7 = arith.constant 0 : index
    %c0_8 = arith.constant 0 : index
    %c0_9 = arith.constant 0 : index
    %c0_10 = arith.constant 0 : index
    %c0_11 = arith.constant 0 : index
    %18 = vector.load %arg3[%c0_7, %c0_8, %c0_9, %c0_10, %c0_11] : memref<1x1x2x2x128xbf16, #tpu.memory_space<vmem>>, vector<1x1x1x2x128xbf16>
    %19 = vector.shape_cast %18 : vector<1x1x1x2x128xbf16> to vector<1x1x2x128xbf16>
    %20 = arith.extf %19 : vector<1x1x2x128xbf16> to vector<1x1x2x128xf32>
    %c0_12 = arith.constant 0 : index
    %c0_13 = arith.constant 0 : index
    %c1 = arith.constant 1 : index
    %c0_14 = arith.constant 0 : index
    %c0_15 = arith.constant 0 : index
    %21 = vector.load %arg3[%c0_12, %c0_13, %c1, %c0_14, %c0_15] : memref<1x1x2x2x128xbf16, #tpu.memory_space<vmem>>, vector<1x1x1x2x128xbf16>
    %22 = vector.shape_cast %21 : vector<1x1x1x2x128xbf16> to vector<1x1x2x128xbf16>
    %23 = arith.extf %22 : vector<1x1x2x128xbf16> to vector<1x1x2x128xf32>
    %cst_16 = arith.constant dense<0.000000e+00> : vector<1x1xf32>
    %24 = vector.multi_reduction <add>, %15, %cst_16 [2, 3] : vector<1x1x2x128xf32> to vector<1x1xf32>
    %cst_17 = arith.constant dense<0.000000e+00> : vector<1x1xf32>
    %25 = vector.multi_reduction <add>, %17, %cst_17 [2, 3] : vector<1x1x2x128xf32> to vector<1x1xf32>
    %26 = arith.mulf %15, %20 : vector<1x1x2x128xf32>
    %cst_18 = arith.constant dense<0.000000e+00> : vector<1x1xf32>
    %27 = vector.multi_reduction <add>, %26, %cst_18 [2, 3] : vector<1x1x2x128xf32> to vector<1x1xf32>
    %28 = arith.mulf %17, %23 : vector<1x1x2x128xf32>
    %cst_19 = arith.constant dense<0.000000e+00> : vector<1x1xf32>
    %29 = vector.multi_reduction <add>, %28, %cst_19 [2, 3] : vector<1x1x2x128xf32> to vector<1x1xf32>
    %cst_20 = arith.constant dense<0.000000e+00> : vector<1x1xf32>
    %30 = vector.multi_reduction <add>, %20, %cst_20 [2, 3] : vector<1x1x2x128xf32> to vector<1x1xf32>
    %cst_21 = arith.constant dense<0.000000e+00> : vector<1x1xf32>
    %31 = vector.multi_reduction <add>, %23, %cst_21 [2, 3] : vector<1x1x2x128xf32> to vector<1x1xf32>
    %c0_22 = arith.constant 0 : index
    %c0_23 = arith.constant 0 : index
    %32 = vector.load %arg5[%c0_22, %c0_23] : memref<1x1xf32, #tpu.memory_space<vmem>>, vector<1x1xf32>
    %33 = arith.subf %24, %27 : vector<1x1xf32>
    %34 = arith.addf %32, %33 : vector<1x1xf32>
    %c0_24 = arith.constant 0 : index
    %c0_25 = arith.constant 0 : index
    %35 = vector.load %arg5[%c0_24, %c0_25] : memref<1x1xf32, #tpu.memory_space<vmem>>, vector<1x1xf32>
    tpu.vector_store %arg5[%c0_24, %c0_25], %34 {strides = array<i32>} : memref<1x1xf32, #tpu.memory_space<vmem>>, vector<1x1xf32>,
    %c0_26 = arith.constant 0 : index
    %c0_27 = arith.constant 0 : index
    %36 = vector.load %arg6[%c0_26, %c0_27] : memref<1x1xf32, #tpu.memory_space<vmem>>, vector<1x1xf32>
    %cst_28 = arith.constant 2.560000e+02 : f32
    %37 = vector.broadcast %cst_28 : f32 to vector<1x1xf32>
    %38 = arith.subf %37, %30 : vector<1x1xf32>
    %39 = arith.addf %24, %38 : vector<1x1xf32>
    %40 = arith.addf %36, %39 : vector<1x1xf32>
    %c0_29 = arith.constant 0 : index
    %c0_30 = arith.constant 0 : index
    %41 = vector.load %arg6[%c0_29, %c0_30] : memref<1x1xf32, #tpu.memory_space<vmem>>, vector<1x1xf32>
    tpu.vector_store %arg6[%c0_29, %c0_30], %40 {strides = array<i32>} : memref<1x1xf32, #tpu.memory_space<vmem>>, vector<1x1xf32>,
    %c0_31 = arith.constant 0 : index
    %c0_32 = arith.constant 0 : index
    %42 = vector.load %arg7[%c0_31, %c0_32] : memref<1x1xf32, #tpu.memory_space<vmem>>, vector<1x1xf32>
    %43 = arith.addf %42, %29 : vector<1x1xf32>
    %c0_33 = arith.constant 0 : index
    %c0_34 = arith.constant 0 : index
    %44 = vector.load %arg7[%c0_33, %c0_34] : memref<1x1xf32, #tpu.memory_space<vmem>>, vector<1x1xf32>
    tpu.vector_store %arg7[%c0_33, %c0_34], %43 {strides = array<i32>} : memref<1x1xf32, #tpu.memory_space<vmem>>, vector<1x1xf32>,
    %c0_35 = arith.constant 0 : index
    %c0_36 = arith.constant 0 : index
    %45 = vector.load %arg8[%c0_35, %c0_36] : memref<1x1xf32, #tpu.memory_space<vmem>>, vector<1x1xf32>
    %46 = arith.addf %25, %31 : vector<1x1xf32>
    %47 = arith.addf %45, %46 : vector<1x1xf32>
    %c0_37 = arith.constant 0 : index
    %c0_38 = arith.constant 0 : index
    %48 = vector.load %arg8[%c0_37, %c0_38] : memref<1x1xf32, #tpu.memory_space<vmem>>, vector<1x1xf32>
    tpu.vector_store %arg8[%c0_37, %c0_38], %47 {strides = array<i32>} : memref<1x1xf32, #tpu.memory_space<vmem>>, vector<1x1xf32>,
    %c0_i32_39 = arith.constant 0 : i32
    %49 = arith.cmpi eq, %arg1, %c0_i32_39 : i32
    %50 = arith.extui %49 : i1 to i32
    %c0_i32_40 = arith.constant 0 : i32
    %51 = arith.cmpi ne, %50, %c0_i32_40 : i32
    scf.if %51 {
      %c0_41 = arith.constant 0 : index
      %c0_42 = arith.constant 0 : index
      %52 = vector.load %arg5[%c0_41, %c0_42] : memref<1x1xf32, #tpu.memory_space<vmem>>, vector<1x1xf32>
      %cst_43 = arith.constant 9.99999974E-6 : f32
      %53 = vector.broadcast %cst_43 : f32 to vector<1x1xf32>
      %54 = arith.addf %52, %53 : vector<1x1xf32>
      %c0_44 = arith.constant 0 : index
      %c0_45 = arith.constant 0 : index
      %55 = vector.load %arg6[%c0_44, %c0_45] : memref<1x1xf32, #tpu.memory_space<vmem>>, vector<1x1xf32>
      %cst_46 = arith.constant 9.99999974E-6 : f32
      %56 = vector.broadcast %cst_46 : f32 to vector<1x1xf32>
      %57 = arith.addf %55, %56 : vector<1x1xf32>
      %58 = arith.divf %54, %57 : vector<1x1xf32>
      %c0_47 = arith.constant 0 : index
      %c0_48 = arith.constant 0 : index
      %59 = vector.load %arg7[%c0_47, %c0_48] : memref<1x1xf32, #tpu.memory_space<vmem>>, vector<1x1xf32>
      %cst_49 = arith.constant 9.99999974E-6 : f32
      %60 = vector.broadcast %cst_49 : f32 to vector<1x1xf32>
      %61 = arith.addf %59, %60 : vector<1x1xf32>
      %c0_50 = arith.constant 0 : index
      %c0_51 = arith.constant 0 : index
      %62 = vector.load %arg8[%c0_50, %c0_51] : memref<1x1xf32, #tpu.memory_space<vmem>>, vector<1x1xf32>
      %cst_52 = arith.constant 9.99999974E-6 : f32
      %63 = vector.broadcast %cst_52 : f32 to vector<1x1xf32>
      %64 = arith.addf %62, %63 : vector<1x1xf32>
      %65 = arith.divf %61, %64 : vector<1x1xf32>
      %cst_53 = arith.constant 1.000000e+00 : f32
      %66 = vector.broadcast %cst_53 : f32 to vector<1x1xf32>
      %67 = arith.subf %66, %58 : vector<1x1xf32>
      %68 = arith.subf %67, %65 : vector<1x1xf32>
      %c0_54 = arith.constant 0 : index
      %c0_55 = arith.constant 0 : index
      %c0_56 = arith.constant 0 : index
      %69 = vector.load %arg4[%c0_54, %c0_55, %c0_56] : memref<1x1x1xf32, #tpu.memory_space<vmem>>, vector<1x1x1xf32>
      %70 = vector.shape_cast %69 : vector<1x1x1xf32> to vector<1x1xf32>
      %71 = vector.shape_cast %68 : vector<1x1xf32> to vector<1x1x1xf32>
      tpu.vector_store %arg4[%c0_54, %c0_55, %c0_56], %71 {strides = array<i32>} : memref<1x1x1xf32, #tpu.memory_space<vmem>>, vector<1x1x1xf32>,
    } else {
    }
    return
  }
  func.func @transform_0(%arg0: i32, %arg1: i32) -> (i32, i32, i32, i32, i32) {
    %c0_i32 = arith.constant 0 : i32
    %c0_i32_0 = arith.constant 0 : i32
    %c0_i32_1 = arith.constant 0 : i32
    %c0_i32_2 = arith.constant 0 : i32
    return %arg0, %c0_i32, %c0_i32_0, %arg1, %c0_i32_1 : i32, i32, i32, i32, i32
  }
  func.func @transform_1(%arg0: i32, %arg1: i32) -> (i32, i32, i32, i32, i32) {
    %c0_i32 = arith.constant 0 : i32
    %c0_i32_0 = arith.constant 0 : i32
    %c0_i32_1 = arith.constant 0 : i32
    %c0_i32_2 = arith.constant 0 : i32
    return %arg0, %c0_i32, %c0_i32_0, %arg1, %c0_i32_1 : i32, i32, i32, i32, i32
  }
  func.func @transform_2(%arg0: i32, %arg1: i32) -> (i32, i32, i32) {
    %c0_i32 = arith.constant 0 : i32
    %c0_i32_0 = arith.constant 0 : i32
    %c0_i32_1 = arith.constant 0 : i32
    return %arg0, %c0_i32, %c0_i32_0 : i32, i32, i32
  }
}

</mosaic_0001>

<bundles_post_ra>
// kernel: dice_loss_pallas.1
= control target key start
LH: loop header
LB: loop body
LE: loop exit
PB: predicated region body
PF: predicated region fallthrough
CT: control target
= control target key end

     0   :  { %s498_s9 = smov 0   ;;  %s500_s10 = smov 0   ;;  %s566_s0 = inlined_call_operand.vmem [shape: f32[2,1,4,2,128], index: 0, kind: input, shape index: {}]   ;;  %s567_s1 = inlined_call_operand.vmem [shape: bf16[2,1,4,2,128], index: 1, kind: input, shape index: {}]   ;;  %s568_s2 = inlined_call_operand.vmem [shape: f32[2,1,1], index: 2, kind: output, shape index: {}]  }
   0x1   :  { %s502_s11 = smov 0  }
   0x2 LB: > { %s24_s12 = sadd.s32 1, %s476_s10  ;;  %p411_p0 = scmp.ge.s32.totalorder %s480_s11, 1  ;;  %s480_s11 = sphi %s502_s11, %s12_s11   ;;  %s476_s10 = sphi %s500_s10, %s570_s10   ;;  %s472_s9 = sphi %s498_s9, %s569_s9  }
   0x3   : > { %p26_p1 = scmp.ge.s32.totalorder %s24_s12, 2  ;;  %p143_p2 = scmp.lt.s32.totalorder %s480_s11, 3 }
   0x5   : > { %s572_s12 = smov (%p26_p1, %s24_s12), 0  ;;  %p144_p3 = pnand %p411_p0, %p143_p2 }
   0x6   : > { %p173_p4 = scmp.lt.s32.totalorder (!%p144_p3), %s472_s9, 1 }
   0x7   : > { %147 = sbr.rel (%p144_p3) target bundleno = 254 (0xfe), region = 28 }
   0xc   : > { %s574_s9 = smov (!%p173_p4, %s472_s9), 1  ;;  %vm204_vm0 = vcmask 1041408   ;;  %vm195_vm1 = vcmask 0   ;;  %v482_v45 = vmov 0.0  }
   0xd   : > { %s414_s13 = sshll.u32 %s574_s9, 2  ;;  %s418_s17 = sshll.u32 %s574_s9, 3  ;;  %197 = vst.msk [vmem:[#allocation3] sm:$0x1] %vm195_vm1, %v482_v45  ;;  %196 = vst.msk [vmem:[#allocation2] sm:$0x1] %vm195_vm1, %v482_v45 }
   0xe   : > { %s522_s16 = scalar_lea.vmem %s567_s1, %s414_s13  ;;  %s180_s20 = scalar_lea.vmem %s566_s0, %s418_s17  ;;  %198 = vst.msk [vmem:[#allocation4] sm:$0x1] %vm195_vm1, %v482_v45  ;;  %199 = vst.msk [vmem:[#allocation5] sm:$0x1] %vm195_vm1, %v482_v45 }
   0xf   : > { %v235_v0 = vld [vmem:[%s522_s16] sm:$0x1]  ;;  %v201_v3 = vld [vmem:[%s180_s20 + $0x2] sm:$0x3]  ;;  %v202_v4 = vld [vmem:[%s180_s20 + $0x4] sm:$0x3]  ;;  %s190_s23 = scalar_lea.vmem %s568_s2, %s574_s9 }
  0x10   : > { %v236_v1 = vunpack.c.l.bf16 %v235_v0  ;;  %v200_v2 = vld [vmem:[%s180_s20] sm:$0x3]  ;;  %v203_v5 = vld [vmem:[%s180_s20 + $0x6] sm:$0x3]  ;;  %v206_v7 = vsel %vm204_vm0, %v201_v3, -inf  ;;  %v207_v8 = vsel %vm204_vm0, %v202_v4, -inf }
  0x11   : > { %v205_v6 = vsel %vm204_vm0, %v200_v2, -inf  ;;  %v208_v10 = vsel %vm204_vm0, %v203_v5, -inf  ;;  %v415_v33 = vld [vmem:[%s522_s16 + $0x1] sm:$0x1] }
  0x12   : > { %v278_v9 = vsel %vm204_vm0, %v236_v1, 0.0  ;;  %v209_v11 = vmax.f32 %v205_v6, %v206_v7  ;;  %v210_v12 = vmax.f32 %v207_v8, %v208_v10  ;;  %v239_v37 = vunpack.c.l.bf16 %v415_v33 }
  0x13   : > { %279 = vadd.xlane.f32.xlu0 %v278_v9 }
  0x14   : > { %v211_v13 = vmax.f32 %v209_v11, %v210_v12  ;;  %v287_v41 = vsel %vm204_vm0, %v239_v37, 0.0 }
  0x15   : > { %v306_v33 = vld [vmem:[#allocation4] sm:$0x1] }
  0x16   : > { %v212_v14 = vsub.f32 %v200_v2, %v211_v13  ;;  %v214_v15 = vsub.f32 %v202_v4, %v211_v13  ;;  %v215_v16 = vsub.f32 %v203_v5, %v211_v13  ;;  %v213_v17 = vsub.f32 %v201_v3, %v211_v13 }
  0x18   : > { %v216_v18 = vmul.f32 1.442695, %v212_v14  ;;  %v220_v19 = vmul.f32 1.442695, %v214_v15  ;;  %v222_v20 = vmul.f32 1.442695, %v215_v16 }
  0x19   : > { %v218_v21 = vmul.f32 1.442695, %v213_v17  ;;  %v301_v15 = vld [vmem:[#allocation3] sm:$0x1] }
  0x1a   : > { %444 = vpow2.f32 %v216_v18 }
  0x1b   : > { %446 = vpow2.f32 %v220_v19 }
  0x1c   : > { %448 = vpow2.f32 %v222_v20 }
  0x1d   : > { %450 = vpow2.f32 %v218_v21 }
  0x27   : > { %v445_v22 = vpop.eup %444 }
  0x28   : > { %v447_v23 = vpop.eup %446  ;;  %v224_v25 = vsel %vm204_vm0, %v445_v22, 0.0 }
  0x29   : > { %v449_v24 = vpop.eup %448  ;;  %v227_v28 = vsel %vm204_vm0, %v447_v23, 0.0 }
  0x2a   : > { %v451_v26 = vpop.eup %450  ;;  %v229_v30 = vsel %vm204_vm0, %v449_v24, 0.0 }
  0x2b   : > { %v225_v27 = vsel %vm204_vm0, %v451_v26, 0.0 }
  0x2c   : > { %v226_v29 = vadd.f32 %v225_v27, %v224_v25  ;;  %v309_v25 = vld [vmem:[#allocation5] sm:$0x1] }
  0x2e   : > { %v228_v31 = vadd.f32 %v227_v28, %v226_v29 }
  0x30   : > { %v230_v32 = vadd.f32 %v229_v30, %v228_v31 }
  0x32   : > { %452 = vrcp.f32 %v230_v32 }
  0x3f   : > { %v453_v34 = vpop.eup %452 }
  0x40   : > { %v234_v35 = vmul.f32 %v453_v34, %v451_v26  ;;  %v233_v36 = vmul.f32 %v453_v34, %v445_v22  ;;  %v296_v26 = vld [vmem:[#allocation2] sm:$0x1] }
  0x42   : > { %v249_v38 = vsel %vm204_vm0, %v234_v35, 0.0  ;;  %v240_v39 = vsel %vm204_vm0, %v233_v36, 0.0  ;;  %v258_v40 = vmul.f32 %v236_v1, %v233_v36  ;;  %v268_v43 = vmul.f32 %v239_v37, %v234_v35 }
  0x43   : > { %250 = vadd.xlane.f32.xlu1 %v249_v38  ;;  %241 = vadd.xlane.f32.xlu0 %v240_v39 }
  0x44   : > { %v259_v42 = vsel %vm204_vm0, %v258_v40, 0.0  ;;  %v269_v44 = vsel %vm204_vm0, %v268_v43, 0.0 }
  0x47   : > { %288 = vadd.xlane.f32.xlu1 %v287_v41  ;;  %260 = vadd.xlane.f32.xlu0 %v259_v42 }
  0x4b   : > { %270 = vadd.xlane.f32.xlu1 %v269_v44 }
  0x9c   : > { %v280_v46 = vpop.xlane.xlu0 %279 }
  0x9d   : > { %v281_v47 = vrot.slane %v280_v46, 4 }
  0x9f   : > { %v282_v48 = vadd.f32 %v281_v47, %v280_v46 }
  0xa1   : > { %v283_v49 = vrot.slane %v282_v48, 2 }
  0xa3   : > { %v284_v50 = vadd.f32 %v283_v49, %v282_v48 }
  0xa5   : > { %v285_v55 = vrot.slane %v284_v50, 1 }
  0xa7   : > { %v286_v0 = vadd.f32 %v285_v55, %v284_v50 }
  0xa9   : > { %v302_v9 = vsub.f32 256.0, %v286_v0 }
  0xcc   : > { %v251_v51 = vpop.xlane.xlu1 %250  ;;  %v242_v52 = vpop.xlane.xlu0 %241 }
  0xcd   : > { %v252_v53 = vrot.slane %v251_v51, 4  ;;  %v243_v54 = vrot.slane %v242_v52, 4 }
  0xcf   : > { %v253_v56 = vadd.f32 %v252_v53, %v251_v51  ;;  %v244_v57 = vadd.f32 %v243_v54, %v242_v52 }
  0xd0   : > { %v289_v58 = vpop.xlane.xlu1 %288  ;;  %v261_v59 = vpop.xlane.xlu0 %260 }
  0xd1   : > { %v254_v60 = vrot.slane %v253_v56, 2  ;;  %v245_v61 = vrot.slane %v244_v57, 2  ;;  %v290_v62 = vrot.slane %v289_v58, 4  ;;  %v262_v63 = vrot.slane %v261_v59, 4 }
  0xd3   : > { %v255_v1 = vadd.f32 %v254_v60, %v253_v56  ;;  %v246_v2 = vadd.f32 %v245_v61, %v244_v57  ;;  %v291_v3 = vadd.f32 %v290_v62, %v289_v58  ;;  %v263_v4 = vadd.f32 %v262_v63, %v261_v59 }
  0xd4   : > { %v271_v5 = vpop.xlane.xlu1 %270 }
  0xd5   : > { %v247_v6 = vrot.slane %v246_v2, 1  ;;  %v292_v7 = vrot.slane %v291_v3, 2  ;;  %v264_v8 = vrot.slane %v263_v4, 2  ;;  %v272_v10 = vrot.slane %v271_v5, 4 }
  0xd6   : > { %v256_v11 = vrot.slane %v255_v1, 1 }
  0xd7   : > { %v248_v12 = vadd.f32 %v247_v6, %v246_v2  ;;  %v293_v13 = vadd.f32 %v292_v7, %v291_v3  ;;  %v265_v14 = vadd.f32 %v264_v8, %v263_v4  ;;  %v273_v16 = vadd.f32 %v272_v10, %v271_v5 }
  0xd8   : > { %v257_v21 = vadd.f32 %v256_v11, %v255_v1 }
  0xd9   : > { %v303_v17 = vadd.f32 %v302_v9, %v248_v12  ;;  %v294_v18 = vrot.slane %v293_v13, 1  ;;  %v266_v19 = vrot.slane %v265_v14, 1  ;;  %v274_v20 = vrot.slane %v273_v16, 2 }
  0xdb   : > { %v304_v22 = vadd.f32 %v303_v17, %v301_v15  ;;  %v295_v23 = vadd.f32 %v294_v18, %v293_v13  ;;  %v267_v24 = vadd.f32 %v266_v19, %v265_v14  ;;  %v275_v27 = vadd.f32 %v274_v20, %v273_v16 }
  0xdd   : > { %305 = vst.msk [vmem:[#allocation3] sm:$0x1] %vm195_vm1, %v304_v22  ;;  %v310_v28 = vadd.f32 %v295_v23, %v257_v21  ;;  %v297_v29 = vsub.f32 %v248_v12, %v267_v24  ;;  %v276_v30 = vrot.slane %v275_v27, 1 }
  0xdf   : > { %v311_v31 = vadd.f32 %v310_v28, %v309_v25  ;;  %v298_v32 = vadd.f32 %v297_v29, %v296_v26  ;;  %v277_v34 = vadd.f32 %v276_v30, %v275_v27 }
  0xe1   : > { %312 = vst.msk [vmem:[#allocation5] sm:$0x1] %vm195_vm1, %v311_v31  ;;  %300 = vst.msk [vmem:[#allocation2] sm:$0x1] %vm195_vm1, %v298_v32  ;;  %v307_v35 = vadd.f32 %v306_v33, %v277_v34 }
  0xe3   : > { %308 = vst.msk [vmem:[#allocation4] sm:$0x1] %vm195_vm1, %v307_v35 }
  0xe4   : > { %v318_v36 = vld [vmem:[#allocation3] sm:$0x1] }
  0xe5   : > { %v319_v37 = vadd.f32 1e-05, %v318_v36 }
  0xe7   : > { %454 = vrcp.f32 %v319_v37 }
  0xe8   : > { %v324_v38 = vld [vmem:[#allocation5] sm:$0x1]  ;;  %v316_v40 = vld [vmem:[#allocation2] sm:$0x1] }
  0xe9   : > { %v325_v39 = vadd.f32 1e-05, %v324_v38  ;;  %v317_v41 = vadd.f32 1e-05, %v316_v40 }
  0xea   : > { %v322_v43 = vld [vmem:[#allocation4] sm:$0x1] }
  0xeb   : > { %456 = vrcp.f32 %v325_v39  ;;  %v323_v45 = vadd.f32 1e-05, %v322_v43 }
  0xf4   : > { %v455_v42 = vpop.eup %454 }
  0xf5   : > { %v321_v44 = vmul.f32 %v455_v42, %v317_v41 }
  0xf7   : > { %v328_v47 = vsub.f32 1.0, %v321_v44 }
  0xf8   : > { %v457_v46 = vpop.eup %456 }
  0xf9   : > { %v327_v48 = vmul.f32 %v457_v46, %v323_v45 }
  0xfb   : > { %v329_v49 = vsub.f32 %v328_v47, %v327_v48 }
  0xfd   : > { %330 = vst.msk [vmem:[%s190_s23] sm:$0x1] %vm195_vm1, %v329_v49 }
  0xfe PF: > { %s12_s11 = sadd.s32 1, %s480_s11   ;;  %s569_s9 = smov %s476_s10 }
  0xff   : > { %p9_p5 = scmp.ge.s32.totalorder %s12_s11, 4   ;;  %s570_s10 = smov %s572_s12 }
 0x101   :  { %11 = sbr.rel (!%p9_p5) target bundleno = 2 (0x2), region = 70 }

</bundles_post_ra>
